<compile_context>
chip_gen: v6e
topology: v6e:2x2x1
jax: 0.10.0
libtpu: 0.0.40
codegen_flags: <defaults>
</compile_context>

<pallas_src>
import jax
import jax.numpy as jnp
from jax.experimental import pallas as pl
from jax.experimental.pallas import tpu as pltpu


def _round_up(n, m):
    return ((n + m - 1) // m) * m


def _make_kernel(B, Tp2, Cin_p, Y, P, Bp, half):
    def kernel(xp_ref, wb_ref, o_ref):
        # xp_ref: (Y + 2, Cin_p)   zero-haloed input, rows = flattened (batch, padded-time);
        #                          row b*Tp2 + tp = x[b, tp-1] (zeros at the halo / tail).
        # wb_ref: (3*Cin_p + 8, Cp) conv taps stacked row-wise, then one bias row, then zeros.
        # o_ref:  (Bp, Cp)
        x0 = xp_ref[pl.ds(0, Y), :]
        x1 = xp_ref[pl.ds(1, Y), :]
        x2 = xp_ref[pl.ds(2, Y), :]
        w0 = wb_ref[pl.ds(0 * Cin_p, Cin_p), :]
        w1 = wb_ref[pl.ds(1 * Cin_p, Cin_p), :]
        w2 = wb_ref[pl.ds(2 * Cin_p, Cin_p), :]
        bias = wb_ref[pl.ds(3 * Cin_p, 1), :].astype(jnp.float32)   # (1, Cp)

        # Conv1d(k=3, s=1, p=1): y[r] = sum_k x_flat[r + k] @ w_k  (f32 accumulation).
        y = jnp.dot(x0, w0, preferred_element_type=jnp.float32)
        y = y + jnp.dot(x1, w1, preferred_element_type=jnp.float32)
        y = y + jnp.dot(x2, w2, preferred_element_type=jnp.float32)
        y = jnp.maximum(y + bias, 0.0)                               # bias + ReLU, vreg-resident

        # MaxPool1d(2, 2): pooled[r] = max(y[r], y[r+1]); only rows whose in-batch time t
        # is even and t < 2*half are selected below (this also gives the odd-T floor).
        pooled = jnp.maximum(y[0:P, :], y[1:P + 1, :])               # (P, Cp)

        # Per-batch mean over the `half` pooled frames as a tiny selection matmul whose
        # matrix is rebuilt in-kernel from iotas (no HBM `sel` input, no O(B^2) array).
        r = jax.lax.broadcasted_iota(jnp.int32, (Bp, P), 1)
        bi = jax.lax.broadcasted_iota(jnp.int32, (Bp, P), 0)
        t = r - bi * Tp2                                             # in-batch conv time
        valid = (bi < B) & (t >= 0) & (t < 2 * half) & ((t & 1) == 0)
        sel = jnp.where(valid, jnp.float32(1.0 / half), jnp.float32(0.0))
        o_ref[...] = jnp.dot(sel, pooled,
                             preferred_element_type=jnp.float32).astype(o_ref.dtype)

    return kernel


def cnn_feature_extractor(x, w, b, operand_dtype=jnp.float32):
    """CNNFeatureExtractor forward.

    x: (B, T, Cin) f32 — same layout the PyTorch module receives.
    w: (Cout, Cin, 3) f32 — torch Conv1d weight layout.
    b: (Cout,) f32 — Conv1d bias.
    operand_dtype: dtype of the conv-matmul operands (bf16 recommended on v5e/v6e/v7x;
      accumulation stays f32 either way).
    Returns (B, Cout) f32.
    """
    B, T, Cin = x.shape
    Cout, Cin_w, K = w.shape
    assert K == 3 and Cin_w == Cin
    assert T >= 2

    half = T // 2                      # MaxPool1d(2,2) floors odd T
    Tp2 = T + 2                        # per-batch rows incl. the zero conv halo
    Cin_p = _round_up(Cin, 8)          # sublane-aligned K for the tap matmuls
    Cp = _round_up(Cout, 128)          # lane-dense output width
    Bp = _round_up(B, 8)               # unmasked (8,128) output store
    P = _round_up(B * Tp2, 8)          # pooled rows (multiple of 8)
    Y = P + 8                          # conv rows (multiple of 8, >= P + 1)

    # ---- wrapper layout plumbing (cheap; weights would be pre-packed at load time) ----
    x_op = x.astype(operand_dtype)
    xp = jnp.pad(x_op, ((0, 0), (1, 1), (0, Cin_p - Cin)))           # conv halo + channel pad
    xp = xp.reshape(B * Tp2, Cin_p)
    xp = jnp.pad(xp, ((0, (Y + 2) - B * Tp2), (0, 0)))               # tail so 3 shifted slabs fit

    w_t = jnp.transpose(w.astype(operand_dtype), (2, 1, 0))          # (3, Cin, Cout)
    taps = jnp.pad(w_t, ((0, 0), (0, Cin_p - Cin), (0, Cp - Cout)))  # (3, Cin_p, Cp)
    taps = taps.reshape(3 * Cin_p, Cp)
    bias_row = jnp.pad(b.astype(operand_dtype)[None, :], ((0, 0), (0, Cp - Cout)))
    wb = jnp.concatenate(
        [taps, bias_row, jnp.zeros((7, Cp), operand_dtype)], axis=0)  # (3*Cin_p + 8, Cp)

    kernel = _make_kernel(B, Tp2, Cin_p, Y, P, Bp, half)

    out = pl.pallas_call(
        kernel,
        out_shape=jax.ShapeDtypeStruct((Bp, Cp), jnp.float32),
        grid_spec=pltpu.PrefetchScalarGridSpec(
            num_scalar_prefetch=0,
            grid=(1,),     # whole (tiny) problem in one step: 2 input DMAs, 1 store
            in_specs=[
                pl.BlockSpec((Y + 2, Cin_p), lambda i: (0, 0)),
                pl.BlockSpec((3 * Cin_p + 8, Cp), lambda i: (0, 0)),
            ],
            out_specs=pl.BlockSpec((Bp, Cp), lambda i: (0, 0)),
        ),
        compiler_params=pltpu.CompilerParams(dimension_semantics=("arbitrary",)),
    )(xp, wb)

    return out[:B, :Cout]


def reference(x, w, b):
    """Pure-JAX reference mirroring the PyTorch forward (torch weight layout)."""
    xt = jnp.transpose(x, (0, 2, 1))                       # (B, Cin, T) == x.permute(0, 2, 1)
    y = jax.lax.conv_general_dilated(
        xt, w, window_strides=(1,), padding=((1, 1),),
        dimension_numbers=("NCH", "OIH", "NCH"))
    y = y + b[None, :, None]
    y = jnp.maximum(y, 0.0)                                # ReLU
    B_, Cout_, T_ = y.shape
    half = T_ // 2
    y = y[:, :, : half * 2].reshape(B_, Cout_, half, 2).max(axis=-1)  # MaxPool1d(2,2), floor
    return y.mean(axis=-1)                                 # mean over time -> (B, Cout)


if __name__ == "__main__":
    B, T, Cin, Cout = 2, 16, 8, 120

    key = jax.random.PRNGKey(0)
    kx, kw, kb = jax.random.split(key, 3)
    x = jax.random.normal(kx, (B, T, Cin), dtype=jnp.float32)
    w = jax.random.normal(kw, (Cout, Cin, 3), dtype=jnp.float32) * 0.1
    b = jax.random.normal(kb, (Cout,), dtype=jnp.float32) * 0.1

    # f32 operands: exact agreement with the f32 reference.
    ref = jax.block_until_ready(reference(x, w, b))
    out = jax.block_until_ready(cnn_feature_extractor(x, w, b))
    assert out.shape == (B, Cout), out.shape
    assert jnp.allclose(out, ref, atol=1e-4, rtol=1e-4), float(jnp.max(jnp.abs(out - ref)))

    # bf16 matmul operands (native MXU format on v5e/v6e/v7x), f32 accumulation.
    out_bf16 = jax.block_until_ready(
        cnn_feature_extractor(x, w, b, operand_dtype=jnp.bfloat16))
    assert jnp.allclose(out_bf16, ref, atol=3e-2, rtol=3e-2), \
        float(jnp.max(jnp.abs(out_bf16 - ref)))

    # odd T: MaxPool1d floor behavior (last frame dropped), previously a hard assert.
    x_odd = x[:, :15, :]
    ref_odd = jax.block_until_ready(reference(x_odd, w, b))
    out_odd = jax.block_until_ready(cnn_feature_extractor(x_odd, w, b))
    assert jnp.allclose(out_odd, ref_odd, atol=1e-4, rtol=1e-4), \
        float(jnp.max(jnp.abs(out_odd - ref_odd)))

    print("KERNEL_OK")
</pallas_src>

<mosaic_0001>
module attributes {stable_mosaic.version = 11 : i64} {
  func.func @kernel(%arg0: i32, %arg1: memref<50x8xf32, #tpu.memory_space<vmem>>, %arg2: memref<32x128xf32, #tpu.memory_space<vmem>>, %arg3: memref<8x128xf32, #tpu.memory_space<vmem>>) attributes {dimension_semantics = [#tpu.dimension_semantics<arbitrary>], iteration_bounds = array<i64: 1>, scalar_prefetch = 0 : i64, scratch_operands = 0 : i64, tpu.core_type = #tpu.core_type<tc>, window_params = [{pipeline_mode = #tpu.pipeline_mode<synchronous>, transform_indices = @transform_0, window_bounds = array<i64: 50, 8>}, {pipeline_mode = #tpu.pipeline_mode<synchronous>, transform_indices = @transform_1, window_bounds = array<i64: 32, 128>}, {pipeline_mode = #tpu.pipeline_mode<synchronous>, transform_indices = @transform_2, window_bounds = array<i64: 8, 128>}]} {
    %c0 = arith.constant 0 : index
    %c0_0 = arith.constant 0 : index
    %0 = vector.load %arg1[%c0, %c0_0] : memref<50x8xf32, #tpu.memory_space<vmem>>, vector<48x8xf32>
    %c1 = arith.constant 1 : index
    %c0_1 = arith.constant 0 : index
    %1 = vector.load %arg1[%c1, %c0_1] : memref<50x8xf32, #tpu.memory_space<vmem>>, vector<48x8xf32>
    %c2 = arith.constant 2 : index
    %c0_2 = arith.constant 0 : index
    %2 = vector.load %arg1[%c2, %c0_2] : memref<50x8xf32, #tpu.memory_space<vmem>>, vector<48x8xf32>
    %c0_3 = arith.constant 0 : index
    %c0_4 = arith.constant 0 : index
    %3 = vector.load %arg2[%c0_3, %c0_4] : memref<32x128xf32, #tpu.memory_space<vmem>>, vector<8x128xf32>
    %c8 = arith.constant 8 : index
    %c0_5 = arith.constant 0 : index
    %4 = vector.load %arg2[%c8, %c0_5] : memref<32x128xf32, #tpu.memory_space<vmem>>, vector<8x128xf32>
    %c16 = arith.constant 16 : index
    %c0_6 = arith.constant 0 : index
    %5 = vector.load %arg2[%c16, %c0_6] : memref<32x128xf32, #tpu.memory_space<vmem>>, vector<8x128xf32>
    %c24 = arith.constant 24 : index
    %c0_7 = arith.constant 0 : index
    %6 = vector.load %arg2[%c24, %c0_7] : memref<32x128xf32, #tpu.memory_space<vmem>>, vector<1x128xf32>
    %cst = arith.constant dense<0.000000e+00> : vector<48x128xf32>
    %7 = tpu.matmul %0, %3, %cst {dimension_numbers = #tpu.dot_dimension_numbers<[1], [0], [0], [1], [0, 0, 1, 1], [], []>} : vector<48x8xf32>, vector<8x128xf32>, vector<48x128xf32> -> vector<48x128xf32>
    %cst_8 = arith.constant dense<0.000000e+00> : vector<48x128xf32>
    %8 = tpu.matmul %1, %4, %cst_8 {dimension_numbers = #tpu.dot_dimension_numbers<[1], [0], [0], [1], [0, 0, 1, 1], [], []>} : vector<48x8xf32>, vector<8x128xf32>, vector<48x128xf32> -> vector<48x128xf32>
    %9 = arith.addf %7, %8 : vector<48x128xf32>
    %cst_9 = arith.constant dense<0.000000e+00> : vector<48x128xf32>
    %10 = tpu.matmul %2, %5, %cst_9 {dimension_numbers = #tpu.dot_dimension_numbers<[1], [0], [0], [1], [0, 0, 1, 1], [], []>} : vector<48x8xf32>, vector<8x128xf32>, vector<48x128xf32> -> vector<48x128xf32>
    %11 = arith.addf %9, %10 : vector<48x128xf32>
    %12 = vector.broadcast %6 : vector<1x128xf32> to vector<48x128xf32>
    %13 = arith.addf %11, %12 : vector<48x128xf32>
    %cst_10 = arith.constant 0.000000e+00 : f32
    %14 = vector.broadcast %cst_10 : f32 to vector<48x128xf32>
    %15 = arith.maximumf %13, %14 : vector<48x128xf32>
    %16 = vector.extract_strided_slice %15 {offsets = [0, 0], sizes = [40, 128], strides = [1, 1]} : vector<48x128xf32> to vector<40x128xf32>
    %17 = vector.extract_strided_slice %15 {offsets = [1, 0], sizes = [40, 128], strides = [1, 1]} : vector<48x128xf32> to vector<40x128xf32>
    %18 = arith.maximumf %16, %17 : vector<40x128xf32>
    %19 = tpu.iota {dimensions = array<i32: 1>} : vector<8x40xi32>
    %20 = tpu.iota {dimensions = array<i32: 0>} : vector<8x40xi32>
    %c18_i32 = arith.constant 18 : i32
    %21 = vector.broadcast %c18_i32 : i32 to vector<8x40xi32>
    %22 = arith.muli %20, %21 : vector<8x40xi32>
    %23 = arith.subi %19, %22 : vector<8x40xi32>
    %c2_i32 = arith.constant 2 : i32
    %24 = vector.broadcast %c2_i32 : i32 to vector<8x40xi32>
    %25 = arith.cmpi slt, %20, %24 : vector<8x40xi32>
    %c0_i32 = arith.constant 0 : i32
    %26 = vector.broadcast %c0_i32 : i32 to vector<8x40xi32>
    %27 = arith.cmpi sge, %23, %26 : vector<8x40xi32>
    %28 = arith.andi %25, %27 : vector<8x40xi1>
    %c16_i32 = arith.constant 16 : i32
    %29 = vector.broadcast %c16_i32 : i32 to vector<8x40xi32>
    %30 = arith.cmpi slt, %23, %29 : vector<8x40xi32>
    %31 = arith.andi %28, %30 : vector<8x40xi1>
    %c1_i32 = arith.constant 1 : i32
    %32 = vector.broadcast %c1_i32 : i32 to vector<8x40xi32>
    %33 = arith.andi %23, %32 : vector<8x40xi32>
    %c0_i32_11 = arith.constant 0 : i32
    %34 = vector.broadcast %c0_i32_11 : i32 to vector<8x40xi32>
    %35 = arith.cmpi eq, %33, %34 : vector<8x40xi32>
    %36 = arith.andi %31, %35 : vector<8x40xi1>
    %cst_12 = arith.constant 1.250000e-01 : f32
    %cst_13 = arith.constant 0.000000e+00 : f32
    %37 = vector.broadcast %cst_12 : f32 to vector<8x40xf32>
    %38 = vector.broadcast %cst_13 : f32 to vector<8x40xf32>
    %39 = arith.select %36, %37, %38 : vector<8x40xi1>, vector<8x40xf32>
    %cst_14 = arith.constant dense<0.000000e+00> : vector<8x128xf32>
    %40 = tpu.matmul %39, %18, %cst_14 {dimension_numbers = #tpu.dot_dimension_numbers<[1], [0], [0], [1], [0, 0, 1, 1], [], []>} : vector<8x40xf32>, vector<40x128xf32>, vector<8x128xf32> -> vector<8x128xf32>
    %c0_15 = arith.constant 0 : index
    %c0_16 = arith.constant 0 : index
    %41 = vector.load %arg3[%c0_15, %c0_16] : memref<8x128xf32, #tpu.memory_space<vmem>>, vector<8x128xf32>
    tpu.vector_store %arg3[%c0_15, %c0_16], %40 {strides = array<i32>} : memref<8x128xf32, #tpu.memory_space<vmem>>, vector<8x128xf32>,
    return
  }
  func.func @transform_0(%arg0: i32) -> (i32, i32) {
    %c0_i32 = arith.constant 0 : i32
    %c0_i32_0 = arith.constant 0 : i32
    %c0_i32_1 = arith.constant 0 : i32
    return %c0_i32, %c0_i32_0 : i32, i32
  }
  func.func @transform_1(%arg0: i32) -> (i32, i32) {
    %c0_i32 = arith.constant 0 : i32
    %c0_i32_0 = arith.constant 0 : i32
    %c0_i32_1 = arith.constant 0 : i32
    return %c0_i32, %c0_i32_0 : i32, i32
  }
  func.func @transform_2(%arg0: i32) -> (i32, i32) {
    %c0_i32 = arith.constant 0 : i32
    %c0_i32_0 = arith.constant 0 : i32
    %c0_i32_1 = arith.constant 0 : i32
    return %c0_i32, %c0_i32_0 : i32, i32
  }
}

</mosaic_0001>

<bundles_post_ra>
// kernel: tpu_custom_call.1
= control target key start
LH: loop header
LB: loop body
LE: loop exit
PB: predicated region body
PF: predicated region fallthrough
CT: control target
= control target key end

     0   :  { %vm34_vm0 = vcmask 64512   ;;  %s765_s0 = inlined_call_operand.vmem [shape: f32[50,8], index: 0, kind: input, shape index: {}]   ;;  %s766_s1 = inlined_call_operand.vmem [shape: f32[32,128], index: 1, kind: input, shape index: {}]   ;;  %s767_s2 = inlined_call_operand.hbm [shape: f32[8,128], index: 2, kind: output, shape index: {}]  }
   0x1   :  { %v31_v0 = vld [vmem:[%s766_s1 + $0x8] sm:$0xff]  ;;  %v30_v5 = vld [vmem:[%s766_s1] sm:$0xff]  ;;  %v32_v6 = vld [vmem:[%s766_s1 + $0x10] sm:$0xff] }
   0x2   :  { %v18_v1 = vld [vmem:[%s765_s0 + $0x1] sm:$0xff]  ;;  %575 = vmatprep.subr.mxu0 %v31_v0  ;;  %621 = vmatprep.subr.mxu1 %v31_v0  ;;  %v19_v3 = vld [vmem:[%s765_s0 + $0x9] sm:$0xff]  ;;  %v20_v7 = vld [vmem:[%s765_s0 + $0x11] sm:$0xff] }
   0x3   :  { %v22_v2 = vld [vmem:[%s765_s0 + $0x21] sm:$0xff]  ;;  %v23_v4 = vld [vmem:[%s765_s0 + $0x29] sm:$0xff]  ;;  %576 = vmatpush3.msra.mxu0 %v31_v0  ;;  %622 = vmatpush3.msra.mxu1 %v31_v0  ;;  %v21_v9 = vld [vmem:[%s765_s0 + $0x19] sm:$0xff] }
   0x4   :  { %577 = vmatprep.mubr.msk.f32.mxu0 %vm34_vm0, %v18_v1  ;;  %583 = vmatprep.mubr.msk.f32.mxu1 %vm34_vm0, %v22_v2  ;;  %v12_v8 = vld [vmem:[%s765_s0] sm:$0xff]  ;;  %v13_v10 = vld [vmem:[%s765_s0 + $0x8] sm:$0xff]  ;;  %v14_v11 = vld [vmem:[%s765_s0 + $0x10] sm:$0xff] }
   0x5   :  { %578 = vmatmul.mubr.msk.f32.vlgmr.msra.gmra.mxu0 %vm34_vm0, %v19_v3  ;;  %584 = vmatmul.mubr.msk.f32.vlgmr.msra.gmra.mxu1 %vm34_vm0, %v23_v4  ;;  %v24_v12 = vld [vmem:[%s765_s0 + $0x2] sm:$0xff] }
   0x6   :  { %586 = vmatprep.subr.mxu1 %v30_v5  ;;  %597 = vmatprep.subr.mxu0 %v32_v6 }
   0x7   :  { %580 = vmatprep.mubr.msk.f32.mxu0 %vm34_vm0, %v20_v7  ;;  %587 = vmatpush3.msra.mxu1 %v30_v5 }
   0x8   :  { %588 = vmatprep.mubr.msk.f32.mxu1 %vm34_vm0, %v12_v8  ;;  %598 = vmatpush3.msra.mxu0 %v32_v6 }
   0x9   :  { %7 = vsyncpa [#allocation3], 0  ;;  %581 = vmatmul.mubr.msk.f32.gmra.mxu0 %vm34_vm0, %v21_v9  ;;  %589 = vmatmul.mubr.msk.f32.vlgmr.msra.gmra.mxu1 %vm34_vm0, %v13_v10  ;;  %v15_v13 = vld [vmem:[%s765_s0 + $0x18] sm:$0xff]  ;;  %v25_v14 = vld [vmem:[%s765_s0 + $0xa] sm:$0xff]  ;;  %v648_v21 = vmov 0.0   ;;  %vm649_vm1 = vmmov 0   ;;  %v424_v32 = vlaneseq }
   0xa   :  { %591 = vmatprep.mubr.msk.f32.mxu1 %vm34_vm0, %v14_v11  ;;  %599 = vmatprep.mubr.msk.f32.mxu0 %vm34_vm0, %v24_v12  ;;  %v16_v15 = vld [vmem:[%s765_s0 + $0x20] sm:$0xff]  ;;  %v26_v16 = vld [vmem:[%s765_s0 + $0x12] sm:$0xff]  ;;  %v17_v17 = vld [vmem:[%s765_s0 + $0x28] sm:$0xff]  ;;  %vm402_vm4 = vcmask 1046528   ;;  %vm439_vm10 = vcmask 326656  }
   0xb   :  { %v27_v18 = vld [vmem:[%s765_s0 + $0x1a] sm:$0xff]  ;;  %v28_v19 = vld [vmem:[%s765_s0 + $0x22] sm:$0xff]  ;;  %v29_v20 = vld [vmem:[%s765_s0 + $0x2a] sm:$0xff]  ;;  %608 = vmatprep.subr.mxu1 %v648_v21  ;;  %v427_v38 = vshrl.u32 %v424_v32, 7  ;;  %v425_v46 = vand.u32 127, %v424_v32 }
   0xc   :  { %v546_v47 = vld [vmem:[%s766_s1 + $0x18] ss:$0 sm:$0xff]  ;;  %s650_s1 = smov [#allocation2]  }
   0xd   :  { %592 = vmatmul.mubr.msk.f32.gmra.mxu1 %vm34_vm0, %v15_v13  ;;  %600 = vmatmul.mubr.msk.f32.vlgmr.msra.gmra.mxu0 %vm34_vm0, %v25_v14  ;;  %v428_v52 = vmul.u32 18, %v427_v38  ;;  %vm430_vm2 = vcmp.lt.s32.totalorder %v427_v38, 2  ;;  %s520_s24 = sshll.u32 %s650_s1, 4  ;;  %s521_s24 = int_to_ptr.vmem [resolvable:$true] %s520_s24 }
   0xe   :  { %594 = vmatprep.mubr.msk.f32.mxu1 %vm34_vm0, %v16_v15  ;;  %602 = vmatprep.mubr.msk.f32.mxu0 %vm34_vm0, %v26_v16  ;;  %s626_s25 = scalar_lea.vmem %s521_s24, 128  ;;  %p631_p1 = scmp.lt.s32.totalorder %s521_s24, %s521_s24 }
   0xf   :  { %v429_v62 = vsub.s32 %v425_v46, %v428_v52  ;;  %p627_p0 = scmp.ne.s32.totalorder %s521_s24, %s626_s25  ;;  %p632_p2 = scmp.lt.s32.totalorder %s626_s25, %s626_s25 }
  0x11   :  { %595 = vmatmul.mubr.msk.f32.gmra.mxu1 %vm34_vm0, %v17_v17  ;;  %603 = vmatmul.mubr.msk.f32.gmra.mxu0 %vm34_vm0, %v27_v18  ;;  %vm431_vm3 = vcmp.ge.s32.totalorder %v429_v62, 0  ;;  %v435_v10 = vand.u32 1, %v429_v62  ;;  %vm433_vm6 = vcmp.lt.s32.totalorder %v429_v62, 16  ;;  %p633_p3 = por %p632_p2, %p631_p1 }
  0x12   :  { %605 = vmatprep.mubr.msk.f32.mxu0 %vm34_vm0, %v28_v19  ;;  %618 = vmatprep.mubr.msk.f32.mxu1 %vm649_vm1, %v648_v21  ;;  %vm432_vm5 = vmand %vm430_vm2, %vm431_vm3 }
  0x13   :  { %vm434_vm7 = vmand %vm432_vm5, %vm433_vm6  ;;  %vm436_vm8 = vcmp.eq.s32.totalorder %v435_v10, 0  ;;  %p634_p4 = pnand %p633_p3, %p627_p0 }
  0x14   :  { %vm437_vm9 = vmand %vm434_vm7, %vm436_vm8 }
  0x15   :  { %606 = vmatmul.mubr.msk.f32.gmra.mxu0 %vm34_vm0, %v29_v20 }
  0xc5   :  { %v579_v22 = vpop.f32.mrf.mxu0  ;;  %v585_v23 = vpop.f32.mrf.mxu1 }
  0xc7   :  { %v119_v24 = vpop.f32.mrf.mxu0  ;;  %v139_v25 = vpop.f32.mrf.mxu1 }
  0xc9   :  { %v582_v26 = vpop.f32.mrf.mxu0  ;;  %v590_v27 = vpop.f32.mrf.mxu1 }
  0xca   :  { %v238_v40 = vadd.f32 %v590_v27, %v579_v22 }
  0xcb   :  { %v129_v28 = vpop.f32.mrf.mxu0  ;;  %v232_v29 = vpop.f32.mrf.mxu1 }
  0xcc   :  { %v233_v41 = vadd.f32 %v232_v29, %v119_v24  ;;  %v438_v24 = vsel %vm437_vm9, 0.125, %v648_v21 }
  0xcd   :  { %v593_v30 = vpop.f32.mrf.mxu1  ;;  %v601_v31 = vpop.f32.mrf.mxu0 }
  0xce   :  { %v248_v35 = vadd.f32 %v593_v30, %v582_v26  ;;  %v375_v48 = vadd.f32 %v601_v31, %v238_v40 }
  0xcf   :  { %v242_v33 = vpop.f32.mrf.mxu1  ;;  %v345_v34 = vpop.f32.mrf.mxu0 }
  0xd0   :  { %v243_v42 = vadd.f32 %v242_v33, %v129_v28  ;;  %v374_v49 = vadd.f32 %v345_v34, %v233_v41  ;;  %v385_v60 = vadd.f32 %v546_v47, %v375_v48 }
  0xd1   :  { %v596_v36 = vpop.f32.mrf.mxu1  ;;  %v604_v37 = vpop.f32.mrf.mxu0 }
  0xd2   :  { %v377_v39 = vadd.f32 %v604_v37, %v248_v35  ;;  %v258_v45 = vadd.f32 %v596_v36, %v585_v23  ;;  %v384_v61 = vadd.f32 %v546_v47, %v374_v49  ;;  %v391_v4 = vmax.f32 %v385_v60, 0.0 }
  0xd3   :  { %v252_v43 = vpop.f32.mrf.mxu1  ;;  %v355_v44 = vpop.f32.mrf.mxu0 }
  0xd4   :  { %v376_v50 = vadd.f32 %v355_v44, %v243_v42  ;;  %v387_v53 = vadd.f32 %v546_v47, %v377_v39  ;;  %v253_v54 = vadd.f32 %v252_v43, %v139_v25  ;;  %v390_v5 = vmax.f32 %v384_v61, 0.0 }
  0xd5   :  { %v607_v51 = vpop.f32.mrf.mxu0  ;;  %v404_v14 = vrot.slane %v391_v4, 1 }
  0xd6   :  { %v379_v55 = vadd.f32 %v607_v51, %v258_v45  ;;  %v386_v56 = vadd.f32 %v546_v47, %v376_v50  ;;  %v393_v63 = vmax.f32 %v387_v53, 0.0  ;;  %v403_v15 = vrot.slane %v390_v5, 1 }
  0xd7   :  { %v365_v57 = vpop.f32.mrf.mxu0 }
  0xd8   :  { %v389_v58 = vadd.f32 %v546_v47, %v379_v55  ;;  %v378_v59 = vadd.f32 %v365_v57, %v253_v54  ;;  %v392_v0 = vmax.f32 %v386_v56, 0.0  ;;  %v408_v6 = vrot.slane %v393_v63, 1 }
  0xd9   :  { %v405_v20 = vsel %vm402_vm4, %v403_v15, %v404_v14 }
  0xda   :  { %v395_v1 = vmax.f32 %v389_v58, 0.0  ;;  %v388_v2 = vadd.f32 %v546_v47, %v378_v59  ;;  %v406_v7 = vrot.slane %v392_v0, 1  ;;  %v419_v23 = vmax.f32 %v390_v5, %v405_v20 }
  0xdc   :  { %v394_v3 = vmax.f32 %v388_v2, 0.0  ;;  %v412_v8 = vrot.slane %v395_v1, 1  ;;  %v409_v16 = vsel %vm402_vm4, %v406_v7, %v408_v6  ;;  %v407_v18 = vsel %vm402_vm4, %v404_v14, %v406_v7 }
  0xdd   :  { %v421_v19 = vmax.f32 %v392_v0, %v409_v16  ;;  %v420_v22 = vmax.f32 %v391_v4, %v407_v18 }
  0xde   :  { %v410_v9 = vrot.slane %v394_v3, 1 }
  0xe0   :  { %v413_v11 = vsel %vm402_vm4, %v410_v9, %v412_v8  ;;  %v411_v12 = vsel %vm402_vm4, %v408_v6, %v410_v9 }
  0xe1   :  { %v423_v13 = vmax.f32 %v394_v3, %v413_v11  ;;  %v422_v17 = vmax.f32 %v393_v63, %v411_v12 }
  0xe3   :  { %609 = vmatpush3.msra.mxu1 %v423_v13 }
  0xe4   :  { %610 = vmatprep.subr.mxu1 %v648_v21 }
  0xe5   :  { %611 = vmatpush3.msra.mxu1 %v422_v17 }
  0xe6   :  { %612 = vmatprep.subr.mxu1 %v648_v21 }
  0xe7   :  { %613 = vmatpush3.msra.mxu1 %v421_v19 }
  0xe8   :  { %614 = vmatprep.subr.mxu1 %v648_v21 }
  0xe9   :  { %615 = vmatpush3.msra.mxu1 %v420_v22 }
  0xea   :  { %616 = vmatprep.subr.mxu1 %v648_v21 }
  0xeb   :  { %617 = vmatpush3.msra.mxu1 %v419_v23 }
  0xec   :  { %619 = vmatmul.mubr.msk.f32.vlgmr.msra.gmra.mxu1 %vm439_vm10, %v438_v24 }
 0x1ac   :  { %v509_v25 = vpop.f32.mrf.mxu1 }
 0x1ad   :  { %513 = vst [vmem:[#allocation2] sm:$0xff] %v509_v25 }
 0x1ae   :  { %v620_v26 = vpop.f32.mrf.mxu1 }
 0x1af   :  { %637 = shalt.err (!%p634_p4)
}
 0x1b0   :  { %523 = dma.vmem_to_hbm [thread:$0]  %s521_s24, 128, %s767_s2, [#allocation3]  }
 0x1b1   :  { %646 = dma.done.wait [#allocation3], 128  }
 0x1b2   :  { %647 = vsyncadd [#allocation3], 4294967168 }
 0x1b3   :  { %527 = vsyncpa [#allocation3], 1 }

</bundles_post_ra>
